<compile_context>
chip_gen: v6e
topology: v6e:2x2x1
jax: 0.10.0
libtpu: 0.0.40
codegen_flags: <defaults>
</compile_context>

<pallas_src>
import jax
import jax.numpy as jnp
from jax import lax
from jax.experimental import pallas as pl
from jax.experimental.pallas import tpu as pltpu


def _conv_stats_kernel(p_ref, w_ref, b_ref, y_ref, stats_ref):
    # p_ref:     (TM, K)        bf16 im2col patches for this row tile
    # w_ref:     (K, Cout_p)    bf16 folded conv weights
    # b_ref:     (1, Cout_p)    f32 conv bias
    # y_ref:     (TM, Cout_p)   f32 conv output (pre-BN), lane-dense
    # stats_ref: (1, 2, Cout_p) f32 per-tile [sum, sum-of-squares] over rows
    y = jnp.dot(p_ref[...], w_ref[...], preferred_element_type=jnp.float32)
    y = y + b_ref[...]
    y_ref[...] = y
    s = jnp.sum(y, axis=0, keepdims=True)          # (1, Cout_p)
    sq = jnp.sum(y * y, axis=0, keepdims=True)     # (1, Cout_p)
    stats_ref[...] = jnp.concatenate([s, sq], axis=0)[None, :, :]


def _bn_relu_kernel(y_ref, scale_ref, shift_ref, o_ref):
    # y = conv_out * (gamma/std) + (beta - mean*gamma/std), then ReLU. All f32.
    o_ref[...] = jnp.maximum(y_ref[...] * scale_ref[...] + shift_ref[...], 0.0)


@jax.jit
def cnn_block(x_nchw, weight, bias, gamma, beta):
    """x_nchw: (N, Cin, H, W); weight: (Cout, Cin, 3, 3); bias/gamma/beta: (Cout,)."""
    N, Cin, H, W = x_nchw.shape
    Cout = weight.shape[0]
    K = 9 * Cin
    LANE = 128
    Cout_p = ((Cout + LANE - 1) // LANE) * LANE       # lane-dense channel axis
    TM = 256                                          # row tile (multiple of 8)
    M = N * H * W
    Mp = ((M + TM - 1) // TM) * TM
    n_tiles = Mp // TM
    pad_rows = Mp - M

    # ---- layout plumbing (plain XLA, done once) ----
    # TODO(synk): padding / NCHW->NHWC transpose / im2col could be fused into the
    # first kernel's loads (halo DMA) to save the extra HBM pass for huge inputs.
    x_nhwc = jnp.transpose(x_nchw, (0, 2, 3, 1)).astype(jnp.float32)
    x_pad = jnp.pad(x_nhwc, ((0, 0), (1, 1), (1, 1), (0, 0)))
    taps = [x_pad[:, ky:ky + H, kx:kx + W, :] for ky in range(3) for kx in range(3)]
    patches = jnp.concatenate(taps, axis=-1).reshape(M, K).astype(jnp.bfloat16)
    if pad_rows:
        patches = jnp.pad(patches, ((0, pad_rows), (0, 0)))

    # (Cout, Cin, 3, 3) -> (3, 3, Cin, Cout) -> (9*Cin, Cout) -> pad channels
    w = jnp.transpose(weight, (2, 3, 1, 0)).reshape(K, Cout).astype(jnp.float32)
    w = jnp.pad(w, ((0, 0), (0, Cout_p - Cout))).astype(jnp.bfloat16)
    b = jnp.pad(bias.astype(jnp.float32), (0, Cout_p - Cout)).reshape(1, Cout_p)
    g = jnp.pad(gamma.astype(jnp.float32), (0, Cout_p - Cout)).reshape(1, Cout_p)
    bt = jnp.pad(beta.astype(jnp.float32), (0, Cout_p - Cout)).reshape(1, Cout_p)

    cparams = pltpu.CompilerParams(
        dimension_semantics=("parallel",),
        vmem_limit_bytes=32 * 1024 * 1024)

    # ---- pass 1: tiled im2col matmul (+bias) + per-tile partial BN stats ----
    y_conv, stats = pl.pallas_call(
        _conv_stats_kernel,
        grid=(n_tiles,),
        in_specs=[
            pl.BlockSpec((TM, K), lambda i: (i, 0)),
            pl.BlockSpec((K, Cout_p), lambda i: (0, 0)),
            pl.BlockSpec((1, Cout_p), lambda i: (0, 0)),
        ],
        out_specs=(
            pl.BlockSpec((TM, Cout_p), lambda i: (i, 0)),
            pl.BlockSpec((1, 2, Cout_p), lambda i: (i, 0, 0)),
        ),
        out_shape=(
            jax.ShapeDtypeStruct((Mp, Cout_p), jnp.float32),
            jax.ShapeDtypeStruct((n_tiles, 2, Cout_p), jnp.float32),
        ),
        compiler_params=cparams,
    )(patches, w, b)

    # ---- global BN statistics (training mode, biased variance, eps=1e-5) ----
    sums = jnp.sum(stats[:, 0, :], axis=0)
    sumsq = jnp.sum(stats[:, 1, :], axis=0)
    if pad_rows:  # padded (all-zero) patch rows contribute exactly `bias` each
        sums = sums - pad_rows * b[0]
        sumsq = sumsq - pad_rows * (b[0] * b[0])
    mean = sums / M
    var = jnp.maximum(sumsq / M - mean * mean, 0.0)
    inv_std = 1.0 / jnp.sqrt(var + 1e-5)
    scale = (g[0] * inv_std).reshape(1, Cout_p)
    shift = (bt[0] - mean * g[0] * inv_std).reshape(1, Cout_p)

    # ---- pass 2: fused BN affine + ReLU (lane-dense stores) ----
    out = pl.pallas_call(
        _bn_relu_kernel,
        grid=(n_tiles,),
        in_specs=[
            pl.BlockSpec((TM, Cout_p), lambda i: (i, 0)),
            pl.BlockSpec((1, Cout_p), lambda i: (0, 0)),
            pl.BlockSpec((1, Cout_p), lambda i: (0, 0)),
        ],
        out_specs=pl.BlockSpec((TM, Cout_p), lambda i: (i, 0)),
        out_shape=jax.ShapeDtypeStruct((Mp, Cout_p), jnp.float32),
        compiler_params=cparams,
    )(y_conv, scale, shift)

    out = out[:M, :Cout].reshape(N, H, W, Cout)
    return jnp.transpose(out, (0, 3, 1, 2))  # back to NCHW


def reference(x_nchw, weight, bias, gamma, beta):
    """Pure-JAX reference matching PyTorch CNNBlock.forward (training-mode BN).

    Inputs / weights are rounded to bf16 to mirror the kernel's MXU operand
    precision (accumulation stays f32 in both paths)."""
    x = x_nchw.astype(jnp.bfloat16).astype(jnp.float32)
    w = weight.astype(jnp.bfloat16).astype(jnp.float32)
    y = lax.conv_general_dilated(
        x, w, window_strides=(1, 1), padding=((1, 1), (1, 1)),
        dimension_numbers=("NCHW", "OIHW", "NCHW"),
        precision=lax.Precision.HIGHEST)
    y = y + bias.reshape(1, -1, 1, 1)
    mean = jnp.mean(y, axis=(0, 2, 3), keepdims=True)
    var = jnp.mean((y - mean) ** 2, axis=(0, 2, 3), keepdims=True)
    y = (y - mean) / jnp.sqrt(var + 1e-5)
    y = y * gamma.reshape(1, -1, 1, 1) + beta.reshape(1, -1, 1, 1)
    return jnp.maximum(y, 0.0)


if __name__ == "__main__":
    N, Cin, Cout, H, W = 2, 4, 8, 16, 16

    key = jax.random.PRNGKey(0)
    kx, kw, kb = jax.random.split(key, 3)

    x = jax.random.normal(kx, (N, Cin, H, W), jnp.float32)
    # Deterministic parameter init (synthetic; shapes match nn.Conv2d / nn.BatchNorm2d).
    fan_in = Cin * 3 * 3
    weight = jax.random.uniform(kw, (Cout, Cin, 3, 3), jnp.float32,
                                -1.0 / jnp.sqrt(fan_in), 1.0 / jnp.sqrt(fan_in))
    bias = jax.random.uniform(kb, (Cout,), jnp.float32,
                              -1.0 / jnp.sqrt(fan_in), 1.0 / jnp.sqrt(fan_in))
    gamma = jnp.ones((Cout,), jnp.float32)   # BatchNorm2d default init
    beta = jnp.zeros((Cout,), jnp.float32)

    out = cnn_block(x, weight, bias, gamma, beta)
    out = jax.block_until_ready(out)

    ref = reference(x, weight, bias, gamma, beta)
    assert out.shape == (N, Cout, H, W), out.shape
    assert jnp.allclose(out, ref, atol=1e-3, rtol=1e-3), \
        float(jnp.max(jnp.abs(out - ref)))

    print("KERNEL_OK")
</pallas_src>

<mosaic_0001>
module attributes {stable_mosaic.version = 11 : i64} {
  func.func @_conv_stats_kernel(%arg0: i32, %arg1: memref<256x36xbf16, #tpu.memory_space<vmem>>, %arg2: memref<36x128xbf16, #tpu.memory_space<vmem>>, %arg3: memref<1x128xf32, #tpu.memory_space<vmem>>, %arg4: memref<256x128xf32, #tpu.memory_space<vmem>>, %arg5: memref<1x2x128xf32, #tpu.memory_space<vmem>>) attributes {dimension_semantics = [#tpu.dimension_semantics<parallel>], iteration_bounds = array<i64: 2>, scalar_prefetch = 0 : i64, scratch_operands = 0 : i64, tpu.core_type = #tpu.core_type<tc>, window_params = [{transform_indices = @transform_0, window_bounds = array<i64: 256, 36>}, {pipeline_mode = #tpu.pipeline_mode<synchronous>, transform_indices = @transform_1, window_bounds = array<i64: 36, 128>}, {pipeline_mode = #tpu.pipeline_mode<synchronous>, transform_indices = @transform_2, window_bounds = array<i64: 1, 128>}, {transform_indices = @transform_3, window_bounds = array<i64: 256, 128>}, {transform_indices = @transform_4, window_bounds = array<i64: 1, 2, 128>}]} {
    %c0 = arith.constant 0 : index
    %c0_0 = arith.constant 0 : index
    %0 = vector.load %arg1[%c0, %c0_0] : memref<256x36xbf16, #tpu.memory_space<vmem>>, vector<256x36xbf16>
    %c0_1 = arith.constant 0 : index
    %c0_2 = arith.constant 0 : index
    %1 = vector.load %arg2[%c0_1, %c0_2] : memref<36x128xbf16, #tpu.memory_space<vmem>>, vector<36x128xbf16>
    %cst = arith.constant dense<0.000000e+00> : vector<256x128xf32>
    %2 = tpu.matmul %0, %1, %cst {dimension_numbers = #tpu.dot_dimension_numbers<[1], [0], [0], [1], [0, 0, 1, 1], [], []>} : vector<256x36xbf16>, vector<36x128xbf16>, vector<256x128xf32> -> vector<256x128xf32>
    %c0_3 = arith.constant 0 : index
    %c0_4 = arith.constant 0 : index
    %3 = vector.load %arg3[%c0_3, %c0_4] : memref<1x128xf32, #tpu.memory_space<vmem>>, vector<1x128xf32>
    %4 = vector.broadcast %3 : vector<1x128xf32> to vector<256x128xf32>
    %5 = arith.addf %2, %4 : vector<256x128xf32>
    %c0_5 = arith.constant 0 : index
    %c0_6 = arith.constant 0 : index
    %6 = vector.load %arg4[%c0_5, %c0_6] : memref<256x128xf32, #tpu.memory_space<vmem>>, vector<256x128xf32>
    tpu.vector_store %arg4[%c0_5, %c0_6], %5 {strides = array<i32>} : memref<256x128xf32, #tpu.memory_space<vmem>>, vector<256x128xf32>,
    %cst_7 = arith.constant dense<0.000000e+00> : vector<128xf32>
    %7 = vector.multi_reduction <add>, %5, %cst_7 [0] : vector<256x128xf32> to vector<128xf32>
    %8 = vector.shape_cast %7 : vector<128xf32> to vector<1x128xf32>
    %9 = arith.mulf %5, %5 : vector<256x128xf32>
    %cst_8 = arith.constant dense<0.000000e+00> : vector<128xf32>
    %10 = vector.multi_reduction <add>, %9, %cst_8 [0] : vector<256x128xf32> to vector<128xf32>
    %11 = vector.shape_cast %10 : vector<128xf32> to vector<1x128xf32>
    %12 = tpu.concatenate %8, %11 in 0 : vector<1x128xf32>, vector<1x128xf32> -> vector<2x128xf32>
    %13 = vector.shape_cast %12 : vector<2x128xf32> to vector<1x2x128xf32>
    %c0_9 = arith.constant 0 : index
    %c0_10 = arith.constant 0 : index
    %c0_11 = arith.constant 0 : index
    %14 = vector.load %arg5[%c0_9, %c0_10, %c0_11] : memref<1x2x128xf32, #tpu.memory_space<vmem>>, vector<1x2x128xf32>
    tpu.vector_store %arg5[%c0_9, %c0_10, %c0_11], %13 {strides = array<i32>} : memref<1x2x128xf32, #tpu.memory_space<vmem>>, vector<1x2x128xf32>,
    return
  }
  func.func @transform_0(%arg0: i32) -> (i32, i32) {
    %c0_i32 = arith.constant 0 : i32
    %c0_i32_0 = arith.constant 0 : i32
    return %arg0, %c0_i32 : i32, i32
  }
  func.func @transform_1(%arg0: i32) -> (i32, i32) {
    %c0_i32 = arith.constant 0 : i32
    %c0_i32_0 = arith.constant 0 : i32
    %c0_i32_1 = arith.constant 0 : i32
    return %c0_i32, %c0_i32_0 : i32, i32
  }
  func.func @transform_2(%arg0: i32) -> (i32, i32) {
    %c0_i32 = arith.constant 0 : i32
    %c0_i32_0 = arith.constant 0 : i32
    %c0_i32_1 = arith.constant 0 : i32
    return %c0_i32, %c0_i32_0 : i32, i32
  }
  func.func @transform_3(%arg0: i32) -> (i32, i32) {
    %c0_i32 = arith.constant 0 : i32
    %c0_i32_0 = arith.constant 0 : i32
    return %arg0, %c0_i32 : i32, i32
  }
  func.func @transform_4(%arg0: i32) -> (i32, i32, i32) {
    %c0_i32 = arith.constant 0 : i32
    %c0_i32_0 = arith.constant 0 : i32
    %c0_i32_1 = arith.constant 0 : i32
    return %arg0, %c0_i32, %c0_i32_0 : i32, i32, i32
  }
}

module attributes {stable_mosaic.version = 11 : i64} {
  func.func @_bn_relu_kernel(%arg0: i32, %arg1: memref<256x128xf32, #tpu.memory_space<vmem>>, %arg2: memref<1x128xf32, #tpu.memory_space<vmem>>, %arg3: memref<1x128xf32, #tpu.memory_space<vmem>>, %arg4: memref<256x128xf32, #tpu.memory_space<vmem>>) attributes {dimension_semantics = [#tpu.dimension_semantics<parallel>], iteration_bounds = array<i64: 2>, scalar_prefetch = 0 : i64, scratch_operands = 0 : i64, tpu.core_type = #tpu.core_type<tc>, window_params = [{transform_indices = @transform_0, window_bounds = array<i64: 256, 128>}, {pipeline_mode = #tpu.pipeline_mode<synchronous>, transform_indices = @transform_1, window_bounds = array<i64: 1, 128>}, {pipeline_mode = #tpu.pipeline_mode<synchronous>, transform_indices = @transform_2, window_bounds = array<i64: 1, 128>}, {transform_indices = @transform_3, window_bounds = array<i64: 256, 128>}]} {
    %c0 = arith.constant 0 : index
    %c0_0 = arith.constant 0 : index
    %0 = vector.load %arg1[%c0, %c0_0] : memref<256x128xf32, #tpu.memory_space<vmem>>, vector<256x128xf32>
    %c0_1 = arith.constant 0 : index
    %c0_2 = arith.constant 0 : index
    %1 = vector.load %arg2[%c0_1, %c0_2] : memref<1x128xf32, #tpu.memory_space<vmem>>, vector<1x128xf32>
    %2 = vector.broadcast %1 : vector<1x128xf32> to vector<256x128xf32>
    %3 = arith.mulf %0, %2 : vector<256x128xf32>
    %c0_3 = arith.constant 0 : index
    %c0_4 = arith.constant 0 : index
    %4 = vector.load %arg3[%c0_3, %c0_4] : memref<1x128xf32, #tpu.memory_space<vmem>>, vector<1x128xf32>
    %5 = vector.broadcast %4 : vector<1x128xf32> to vector<256x128xf32>
    %6 = arith.addf %3, %5 : vector<256x128xf32>
    %cst = arith.constant 0.000000e+00 : f32
    %7 = vector.broadcast %cst : f32 to vector<256x128xf32>
    %8 = arith.maximumf %6, %7 : vector<256x128xf32>
    %c0_5 = arith.constant 0 : index
    %c0_6 = arith.constant 0 : index
    %9 = vector.load %arg4[%c0_5, %c0_6] : memref<256x128xf32, #tpu.memory_space<vmem>>, vector<256x128xf32>
    tpu.vector_store %arg4[%c0_5, %c0_6], %8 {strides = array<i32>} : memref<256x128xf32, #tpu.memory_space<vmem>>, vector<256x128xf32>,
    return
  }
  func.func @transform_0(%arg0: i32) -> (i32, i32) {
    %c0_i32 = arith.constant 0 : i32
    %c0_i32_0 = arith.constant 0 : i32
    return %arg0, %c0_i32 : i32, i32
  }
  func.func @transform_1(%arg0: i32) -> (i32, i32) {
    %c0_i32 = arith.constant 0 : i32
    %c0_i32_0 = arith.constant 0 : i32
    %c0_i32_1 = arith.constant 0 : i32
    return %c0_i32, %c0_i32_0 : i32, i32
  }
  func.func @transform_2(%arg0: i32) -> (i32, i32) {
    %c0_i32 = arith.constant 0 : i32
    %c0_i32_0 = arith.constant 0 : i32
    %c0_i32_1 = arith.constant 0 : i32
    return %c0_i32, %c0_i32_0 : i32, i32
  }
  func.func @transform_3(%arg0: i32) -> (i32, i32) {
    %c0_i32 = arith.constant 0 : i32
    %c0_i32_0 = arith.constant 0 : i32
    return %arg0, %c0_i32 : i32, i32
  }
}

</mosaic_0001>

<bundles_post_ra>
// kernel: cnn_block.3
= control target key start
LH: loop header
LB: loop body
LE: loop exit
PB: predicated region body
PF: predicated region fallthrough
CT: control target
= control target key end

     0   :  { %s453_s12 = smov 0   ;;  %s612_s0 = inlined_call_operand.vmem [shape: f32[512,128], index: 0, kind: input, shape index: {}]   ;;  %s613_s1 = inlined_call_operand.vmem [shape: f32[1,128], index: 1, kind: input, shape index: {}]   ;;  %s614_s2 = inlined_call_operand.vmem [shape: f32[1,128], index: 2, kind: input, shape index: {}]   ;;  %s615_s3 = inlined_call_operand.vmem [shape: f32[512,128], index: 3, kind: output, shape index: {}]  }
   0x1 LB: > { %s404_s13 = sadd.s32 4294967295, %s431_s12   ;;  %p408_p0 = scmp.ge.s32.totalorder %s431_s12, 1  ;;  %s431_s12 = sphi %s453_s12, %s13_s12  }
   0x2   : > { %p138_p1 = scmp.lt.s32.totalorder %s431_s12, 3 }
   0x4   : > { %p139_p2 = pnand %p408_p0, %p138_p1 }
   0x5   : > { %s409_s14 = sshll.u32 (!%p139_p2), %s404_s13, 5 }
   0x6   : > { %142 = sbr.rel (%p139_p2) target bundleno = 44 (0x2c), region = 32  ;;  %p163_p3 = scmp.lt.s32.totalorder (!%p139_p2), %s409_s14, 63 }
   0xb   : > { %s617_s14 = smov (!%p163_p3, %s409_s14), 63  ;;  %v464_v0 = vld [vmem:[%s613_s1] ss:$0 sm:$0xff] }
   0xc   : > { %s410_s15 = sshll.u32 %s617_s14, 3  ;;  %v474_v1 = vld [vmem:[%s614_s2] ss:$0 sm:$0xff] }
   0xd   : > { %s469_s20 = scalar_lea.vmem %s612_s0, %s410_s15  ;;  %s497_s25 = scalar_lea.vmem %s615_s3, %s410_s15 }
   0xe   : > { %v174_v2 = vld [vmem:[%s469_s20] sm:$0xff]  ;;  %v175_v3 = vld [vmem:[%s469_s20 + $0x8] sm:$0xff]  ;;  %v176_v4 = vld [vmem:[%s469_s20 + $0x10] sm:$0xff] }
   0xf   : > { %v213_v5 = vmul.f32 %v464_v0, %v174_v2  ;;  %v214_v6 = vmul.f32 %v464_v0, %v175_v3  ;;  %v215_v7 = vmul.f32 %v464_v0, %v176_v4  ;;  %v177_v8 = vld [vmem:[%s469_s20 + $0x18] sm:$0xff]  ;;  %v178_v9 = vld [vmem:[%s469_s20 + $0x20] sm:$0xff]  ;;  %v179_v10 = vld [vmem:[%s469_s20 + $0x28] sm:$0xff] }
  0x10   : > { %v216_v11 = vmul.f32 %v464_v0, %v177_v8  ;;  %v217_v12 = vmul.f32 %v464_v0, %v178_v9  ;;  %v218_v13 = vmul.f32 %v464_v0, %v179_v10  ;;  %v180_v14 = vld [vmem:[%s469_s20 + $0x30] sm:$0xff]  ;;  %v181_v15 = vld [vmem:[%s469_s20 + $0x38] sm:$0xff]  ;;  %v182_v24 = vld [vmem:[%s469_s20 + $0x40] sm:$0xff] }
  0x11   : > { %v252_v16 = vadd.f32 %v474_v1, %v213_v5  ;;  %v253_v17 = vadd.f32 %v474_v1, %v214_v6  ;;  %v254_v18 = vadd.f32 %v474_v1, %v215_v7  ;;  %v219_v19 = vmul.f32 %v464_v0, %v180_v14  ;;  %v183_v25 = vld [vmem:[%s469_s20 + $0x48] sm:$0xff]  ;;  %v184_v26 = vld [vmem:[%s469_s20 + $0x50] sm:$0xff]  ;;  %v185_v31 = vld [vmem:[%s469_s20 + $0x58] sm:$0xff] }
  0x12   : > { %v255_v20 = vadd.f32 %v474_v1, %v216_v11  ;;  %v256_v21 = vadd.f32 %v474_v1, %v217_v12  ;;  %v257_v22 = vadd.f32 %v474_v1, %v218_v13  ;;  %v220_v23 = vmul.f32 %v464_v0, %v181_v15  ;;  %v186_v32 = vld [vmem:[%s469_s20 + $0x60] sm:$0xff]  ;;  %v187_v33 = vld [vmem:[%s469_s20 + $0x68] sm:$0xff]  ;;  %v188_v38 = vld [vmem:[%s469_s20 + $0x70] sm:$0xff] }
  0x13   : > { %v284_v27 = vmax.f32 %v252_v16, 0.0  ;;  %v285_v28 = vmax.f32 %v253_v17, 0.0  ;;  %v286_v29 = vmax.f32 %v254_v18, 0.0  ;;  %v258_v30 = vadd.f32 %v474_v1, %v219_v19  ;;  %v189_v43 = vld [vmem:[%s469_s20 + $0x78] sm:$0xff]  ;;  %v190_v56 = vld [vmem:[%s469_s20 + $0x80] sm:$0xff]  ;;  %v191_v57 = vld [vmem:[%s469_s20 + $0x88] sm:$0xff] }
  0x14   : > { %v287_v34 = vmax.f32 %v255_v20, 0.0  ;;  %v288_v35 = vmax.f32 %v256_v21, 0.0  ;;  %v289_v36 = vmax.f32 %v257_v22, 0.0  ;;  %v259_v37 = vadd.f32 %v474_v1, %v220_v23  ;;  %v192_v58 = vld [vmem:[%s469_s20 + $0x90] sm:$0xff]  ;;  %v193_v63 = vld [vmem:[%s469_s20 + $0x98] sm:$0xff]  ;;  %v194_v2 = vld [vmem:[%s469_s20 + $0xa0] sm:$0xff] }
  0x15   : > { %316 = vst [vmem:[%s497_s25] sm:$0xff] %v284_v27  ;;  %317 = vst [vmem:[%s497_s25 + $0x8] sm:$0xff] %v285_v28  ;;  %v290_v39 = vmax.f32 %v258_v30, 0.0  ;;  %v221_v40 = vmul.f32 %v464_v0, %v182_v24  ;;  %v222_v41 = vmul.f32 %v464_v0, %v183_v25  ;;  %v223_v42 = vmul.f32 %v464_v0, %v184_v26  ;;  %v195_v3 = vld [vmem:[%s469_s20 + $0xa8] sm:$0xff]  ;;  %v196_v8 = vld [vmem:[%s469_s20 + $0xb0] sm:$0xff] }
  0x16   : > { %318 = vst [vmem:[%s497_s25 + $0x10] sm:$0xff] %v286_v29  ;;  %319 = vst [vmem:[%s497_s25 + $0x18] sm:$0xff] %v287_v34  ;;  %v291_v44 = vmax.f32 %v259_v37, 0.0  ;;  %v224_v45 = vmul.f32 %v464_v0, %v185_v31  ;;  %v225_v46 = vmul.f32 %v464_v0, %v186_v32  ;;  %v226_v47 = vmul.f32 %v464_v0, %v187_v33  ;;  %v197_v13 = vld [vmem:[%s469_s20 + $0xb8] sm:$0xff]  ;;  %v198_v26 = vld [vmem:[%s469_s20 + $0xc0] sm:$0xff] }
  0x17   : > { %320 = vst [vmem:[%s497_s25 + $0x20] sm:$0xff] %v288_v35  ;;  %321 = vst [vmem:[%s497_s25 + $0x28] sm:$0xff] %v289_v36  ;;  %v260_v48 = vadd.f32 %v474_v1, %v221_v40  ;;  %v261_v49 = vadd.f32 %v474_v1, %v222_v41  ;;  %v262_v50 = vadd.f32 %v474_v1, %v223_v42  ;;  %v199_v27 = vld [vmem:[%s469_s20 + $0xc8] sm:$0xff]  ;;  %v200_v28 = vld [vmem:[%s469_s20 + $0xd0] sm:$0xff] }
  0x18   : > { %322 = vst [vmem:[%s497_s25 + $0x30] sm:$0xff] %v290_v39  ;;  %v227_v51 = vmul.f32 %v464_v0, %v188_v38  ;;  %323 = vst [vmem:[%s497_s25 + $0x38] sm:$0xff] %v291_v44  ;;  %v263_v52 = vadd.f32 %v474_v1, %v224_v45  ;;  %v264_v53 = vadd.f32 %v474_v1, %v225_v46  ;;  %v201_v33 = vld [vmem:[%s469_s20 + $0xd8] sm:$0xff]  ;;  %v202_v34 = vld [vmem:[%s469_s20 + $0xe0] sm:$0xff] }
  0x19   : > { %v265_v54 = vadd.f32 %v474_v1, %v226_v47  ;;  %v228_v55 = vmul.f32 %v464_v0, %v189_v43  ;;  %v292_v59 = vmax.f32 %v260_v48, 0.0  ;;  %v293_v60 = vmax.f32 %v261_v49, 0.0  ;;  %v203_v35 = vld [vmem:[%s469_s20 + $0xe8] sm:$0xff]  ;;  %v204_v40 = vld [vmem:[%s469_s20 + $0xf0] sm:$0xff]  ;;  %v205_v45 = vld [vmem:[%s469_s20 + $0xf8] sm:$0xff] }
  0x1a   : > { %v294_v61 = vmax.f32 %v262_v50, 0.0  ;;  %v266_v62 = vadd.f32 %v474_v1, %v227_v51  ;;  %v295_v4 = vmax.f32 %v263_v52, 0.0  ;;  %v296_v5 = vmax.f32 %v264_v53, 0.0 }
  0x1b   : > { %v297_v6 = vmax.f32 %v265_v54, 0.0  ;;  %v267_v7 = vadd.f32 %v474_v1, %v228_v55  ;;  %324 = vst [vmem:[%s497_s25 + $0x40] sm:$0xff] %v292_v59  ;;  %325 = vst [vmem:[%s497_s25 + $0x48] sm:$0xff] %v293_v60  ;;  %v229_v10 = vmul.f32 %v464_v0, %v190_v56  ;;  %v230_v11 = vmul.f32 %v464_v0, %v191_v57 }
  0x1c   : > { %326 = vst [vmem:[%s497_s25 + $0x50] sm:$0xff] %v294_v61  ;;  %v298_v9 = vmax.f32 %v266_v62, 0.0  ;;  %v231_v12 = vmul.f32 %v464_v0, %v192_v58  ;;  %327 = vst [vmem:[%s497_s25 + $0x58] sm:$0xff] %v295_v4  ;;  %v232_v15 = vmul.f32 %v464_v0, %v193_v63  ;;  %v233_v16 = vmul.f32 %v464_v0, %v194_v2 }
  0x1d   : > { %328 = vst [vmem:[%s497_s25 + $0x60] sm:$0xff] %v296_v5  ;;  %329 = vst [vmem:[%s497_s25 + $0x68] sm:$0xff] %v297_v6  ;;  %v299_v14 = vmax.f32 %v267_v7, 0.0  ;;  %v234_v17 = vmul.f32 %v464_v0, %v195_v3  ;;  %v268_v18 = vadd.f32 %v474_v1, %v229_v10  ;;  %v269_v19 = vadd.f32 %v474_v1, %v230_v11 }
  0x1e   : > { %330 = vst [vmem:[%s497_s25 + $0x70] sm:$0xff] %v298_v9  ;;  %v270_v20 = vadd.f32 %v474_v1, %v231_v12  ;;  %v235_v21 = vmul.f32 %v464_v0, %v196_v8  ;;  %v271_v22 = vadd.f32 %v474_v1, %v232_v15  ;;  %v272_v23 = vadd.f32 %v474_v1, %v233_v16 }
  0x1f   : > { %331 = vst [vmem:[%s497_s25 + $0x78] sm:$0xff] %v299_v14  ;;  %v273_v24 = vadd.f32 %v474_v1, %v234_v17  ;;  %v236_v25 = vmul.f32 %v464_v0, %v197_v13  ;;  %v300_v29 = vmax.f32 %v268_v18, 0.0  ;;  %v301_v30 = vmax.f32 %v269_v19, 0.0 }
  0x20   : > { %v302_v31 = vmax.f32 %v270_v20, 0.0  ;;  %v274_v32 = vadd.f32 %v474_v1, %v235_v21  ;;  %v303_v36 = vmax.f32 %v271_v22, 0.0  ;;  %v304_v37 = vmax.f32 %v272_v23, 0.0 }
  0x21   : > { %v305_v38 = vmax.f32 %v273_v24, 0.0  ;;  %v275_v39 = vadd.f32 %v474_v1, %v236_v25  ;;  %332 = vst [vmem:[%s497_s25 + $0x80] sm:$0xff] %v300_v29  ;;  %333 = vst [vmem:[%s497_s25 + $0x88] sm:$0xff] %v301_v30  ;;  %v237_v42 = vmul.f32 %v464_v0, %v198_v26  ;;  %v238_v43 = vmul.f32 %v464_v0, %v199_v27 }
  0x22   : > { %334 = vst [vmem:[%s497_s25 + $0x90] sm:$0xff] %v302_v31  ;;  %v306_v41 = vmax.f32 %v274_v32, 0.0  ;;  %v239_v44 = vmul.f32 %v464_v0, %v200_v28  ;;  %335 = vst [vmem:[%s497_s25 + $0x98] sm:$0xff] %v303_v36  ;;  %v240_v47 = vmul.f32 %v464_v0, %v201_v33  ;;  %v241_v48 = vmul.f32 %v464_v0, %v202_v34 }
  0x23   : > { %336 = vst [vmem:[%s497_s25 + $0xa0] sm:$0xff] %v304_v37  ;;  %337 = vst [vmem:[%s497_s25 + $0xa8] sm:$0xff] %v305_v38  ;;  %v307_v46 = vmax.f32 %v275_v39, 0.0  ;;  %v242_v49 = vmul.f32 %v464_v0, %v203_v35  ;;  %v276_v50 = vadd.f32 %v474_v1, %v237_v42  ;;  %v277_v51 = vadd.f32 %v474_v1, %v238_v43 }
  0x24   : > { %338 = vst [vmem:[%s497_s25 + $0xb0] sm:$0xff] %v306_v41  ;;  %v278_v52 = vadd.f32 %v474_v1, %v239_v44  ;;  %v243_v53 = vmul.f32 %v464_v0, %v204_v40  ;;  %v279_v54 = vadd.f32 %v474_v1, %v240_v47  ;;  %v280_v55 = vadd.f32 %v474_v1, %v241_v48 }
  0x25   : > { %339 = vst [vmem:[%s497_s25 + $0xb8] sm:$0xff] %v307_v46  ;;  %v281_v56 = vadd.f32 %v474_v1, %v242_v49  ;;  %v244_v57 = vmul.f32 %v464_v0, %v205_v45  ;;  %v308_v58 = vmax.f32 %v276_v50, 0.0  ;;  %v309_v59 = vmax.f32 %v277_v51, 0.0 }
  0x26   : > { %v310_v60 = vmax.f32 %v278_v52, 0.0  ;;  %v282_v61 = vadd.f32 %v474_v1, %v243_v53  ;;  %v311_v62 = vmax.f32 %v279_v54, 0.0  ;;  %v312_v63 = vmax.f32 %v280_v55, 0.0 }
  0x27   : > { %v313_v2 = vmax.f32 %v281_v56, 0.0  ;;  %v283_v3 = vadd.f32 %v474_v1, %v244_v57  ;;  %340 = vst [vmem:[%s497_s25 + $0xc0] sm:$0xff] %v308_v58  ;;  %341 = vst [vmem:[%s497_s25 + $0xc8] sm:$0xff] %v309_v59 }
  0x28   : > { %342 = vst [vmem:[%s497_s25 + $0xd0] sm:$0xff] %v310_v60  ;;  %v314_v4 = vmax.f32 %v282_v61, 0.0  ;;  %343 = vst [vmem:[%s497_s25 + $0xd8] sm:$0xff] %v311_v62 }
  0x29   : > { %344 = vst [vmem:[%s497_s25 + $0xe0] sm:$0xff] %v312_v63  ;;  %345 = vst [vmem:[%s497_s25 + $0xe8] sm:$0xff] %v313_v2  ;;  %v315_v0 = vmax.f32 %v283_v3, 0.0 }
  0x2a   : > { %346 = vst [vmem:[%s497_s25 + $0xf0] sm:$0xff] %v314_v4 }
  0x2b   : > { %347 = vst [vmem:[%s497_s25 + $0xf8] sm:$0xff] %v315_v0 }
  0x2c PF: > { %s13_s12 = sadd.s32 1, %s431_s12  }
  0x2d   : > { %p10_p4 = scmp.ge.s32.totalorder %s13_s12, 4  }
  0x2f   :  { %12 = sbr.rel (!%p10_p4) target bundleno = 1 (0x1), region = 62 }

// kernel: cnn_block.2
= control target key start
LH: loop header
LB: loop body
LE: loop exit
PB: predicated region body
PF: predicated region fallthrough
CT: control target
= control target key end

     0   :  { %s967_s15 = smov 0   ;;  %s1182_s0 = inlined_call_operand.vmem [shape: bf16[512,36], index: 0, kind: input, shape index: {}]   ;;  %s1183_s1 = inlined_call_operand.vmem [shape: bf16[36,128], index: 1, kind: input, shape index: {}]   ;;  %s1184_s2 = inlined_call_operand.vmem [shape: f32[1,128], index: 2, kind: input, shape index: {}]   ;;  %s1185_s3 = inlined_call_operand.vmem [shape: f32[512,128], index: 3, kind: output, shape index: {0}]   ;;  %s1186_s4 = inlined_call_operand.vmem [shape: f32[2,2,128], index: 4, kind: output, shape index: {1}]  }
   0x1 LB: > { %s973_s16 = sadd.s32 4294967295, %s940_s15   ;;  %p798_p0 = scmp.ge.s32.totalorder %s940_s15, 1  ;;  %s940_s15 = sphi %s967_s15, %s15_s15  }
   0x2   : > { %p166_p1 = scmp.lt.s32.totalorder %s940_s15, 3 }
   0x4   : > { %p167_p2 = pnand %p798_p0, %p166_p1 }
   0x5   : > { %s799_s21 = sshll.u32 (!%p167_p2), %s973_s16, 5  ;;  %p208_p4 = scmp.lt.s32.totalorder (!%p167_p2), %s973_s16, 1 }
   0x6   : > { %170 = sbr.rel (%p167_p2) target bundleno = 303 (0x12f), region = 32  ;;  %p197_p3 = scmp.lt.s32.totalorder (!%p167_p2), %s799_s21, 63 }
   0xb   : > { %v915_v0 = vld [vmem:[%s1183_s1 + $0x10] ss:$0 sps:$4 sm:$0x33]   ;;  %vm401_vm0 = vcmask 1041408   ;;  %v916_v1 = vld [vmem:[%s1183_s1 + $0x8] sm:$0xff]   ;;  %v917_v3 = vld [vmem:[%s1183_s1] sm:$0xff]  }
   0xc   : > { %905 = vmatprep.subr.msk.bf16.mxu0 %vm401_vm0, %v915_v0  ;;  %v403_v2 = vsel %vm401_vm0, %v915_v0, 0  ;;  %906 = vmatprep.subr.msk.bf16.mxu1 %vm401_vm0, %v915_v0  ;;  %s1188_s21 = smov (!%p197_p3, %s799_s21), 63  ;;  %vm352_vm1 = vcmask 293888   ;;  %v1031_v20 = vld [vmem:[%s1184_s2] ss:$0 sm:$0xff]  ;;  %s1190_s16 = smov (!%p208_p4, %s973_s16), 1 }
   0xd   : > { %862 = vmatpush3.bf16.msra.mxu0 %v403_v2  ;;  %902 = vmatpush3.bf16.msra.mxu1 %v403_v2  ;;  %s800_s24 = sshll.u32 %s1188_s21, 2  ;;  %s802_s28 = sshll.u32 %s1188_s21, 3  ;;  %vm704_vm2 = vcmask 1040384  }
   0xe   : > { %863 = vmatprep.subr.bf16.mxu0 %v916_v1  ;;  %900 = vmatprep.subr.bf16.mxu1 %v916_v1  ;;  %s993_s27 = scalar_lea.vmem %s1182_s0, %s800_s24  ;;  %s1036_s7 = scalar_lea.vmem %s1185_s3, %s802_s28 }
   0xf   : > { %v918_v4 = vld [vmem:[%s993_s27] sm:$0xff]   ;;  %v919_v5 = vld [vmem:[%s993_s27 + $0x8] sm:$0xff]   ;;  %v920_v6 = vld [vmem:[%s993_s27 + $0x10] sm:$0xff]   ;;  %s803_s8 = sshll.u32 %s1190_s16, 1 }
  0x10   : > { %867 = vmatprep.mubr.msk.bf16.mxu0 %vm352_vm1, %v918_v4  ;;  %v921_v7 = vld [vmem:[%s993_s27 + $0x18] sm:$0xff]   ;;  %v922_v8 = vld [vmem:[%s993_s27 + $0x20] sm:$0xff]   ;;  %v927_v10 = vld [vmem:[%s993_s27 + $0x48] sm:$0xff]   ;;  %s211_s11 = scalar_lea.vmem %s1186_s4, %s803_s8 }
  0x11   : > { %864 = vmatpush3.bf16.msra.mxu0 %v916_v1  ;;  %903 = vmatpush3.bf16.msra.mxu1 %v916_v1  ;;  %v926_v9 = vld [vmem:[%s993_s27 + $0x40] sm:$0xff]   ;;  %v928_v11 = vld [vmem:[%s993_s27 + $0x50] sm:$0xff]   ;;  %v929_v12 = vld [vmem:[%s993_s27 + $0x58] sm:$0xff]  }
  0x12   : > { %865 = vmatprep.subr.bf16.mxu0 %v917_v3  ;;  %901 = vmatprep.subr.bf16.mxu1 %v917_v3  ;;  %v930_v13 = vld [vmem:[%s993_s27 + $0x60] sm:$0xff]   ;;  %v923_v14 = vld [vmem:[%s993_s27 + $0x28] sm:$0xff]   ;;  %v924_v15 = vld [vmem:[%s993_s27 + $0x30] sm:$0xff]  }
  0x13   : > { %883 = vmatprep.mubr.msk.bf16.mxu1 %vm352_vm1, %v926_v9  ;;  %v931_v16 = vld [vmem:[%s993_s27 + $0x68] sm:$0xff]   ;;  %v932_v17 = vld [vmem:[%s993_s27 + $0x70] sm:$0xff]   ;;  %v925_v18 = vld [vmem:[%s993_s27 + $0x38] sm:$0xff]  }
  0x14   : > { %v933_v19 = vld [vmem:[%s993_s27 + $0x78] sm:$0xff]  }
  0x15   : > { %866 = vmatpush3.bf16.msra.mxu0 %v917_v3  ;;  %904 = vmatpush3.bf16.msra.mxu1 %v917_v3 }
  0x18   : > { %868 = vmatmul.mubr.msk.bf16.vlgmr.msra.gmra.mxu0 %vm352_vm1, %v919_v5  ;;  %884 = vmatmul.mubr.msk.bf16.vlgmr.msra.gmra.mxu1 %vm352_vm1, %v927_v10 }
  0x19   : > { %871 = vmatprep.mubr.msk.bf16.mxu0 %vm352_vm1, %v920_v6  ;;  %887 = vmatprep.mubr.msk.bf16.mxu1 %vm352_vm1, %v928_v11 }
  0x20   : > { %872 = vmatmul.mubr.msk.bf16.gmra.mxu0 %vm352_vm1, %v921_v7  ;;  %888 = vmatmul.mubr.msk.bf16.gmra.mxu1 %vm352_vm1, %v929_v12 }
  0x21   : > { %875 = vmatprep.mubr.msk.bf16.mxu0 %vm352_vm1, %v922_v8  ;;  %891 = vmatprep.mubr.msk.bf16.mxu1 %vm352_vm1, %v930_v13 }
  0x28   : > { %876 = vmatmul.mubr.msk.bf16.gmra.mxu0 %vm352_vm1, %v923_v14  ;;  %892 = vmatmul.mubr.msk.bf16.gmra.mxu1 %vm352_vm1, %v931_v16 }
  0x29   : > { %879 = vmatprep.mubr.msk.bf16.mxu0 %vm352_vm1, %v924_v15  ;;  %895 = vmatprep.mubr.msk.bf16.mxu1 %vm352_vm1, %v932_v17 }
  0x30   : > { %880 = vmatmul.mubr.msk.bf16.gmra.mxu0 %vm352_vm1, %v925_v18  ;;  %896 = vmatmul.mubr.msk.bf16.gmra.mxu1 %vm352_vm1, %v933_v19 }
  0xd8   : > { %v869_v21 = vpop.f32.mrf.mxu0  ;;  %v885_v28 = vpop.f32.mrf.mxu1 }
  0xd9   : > { %v448_v22 = vadd.f32 %v869_v21, %v1031_v20  ;;  %v1046_v30 = vadd.f32 %v885_v28, %v1031_v20 }
  0xda   : > { %v439_v23 = vpop.f32.mrf.mxu0  ;;  %v503_v32 = vpop.f32.mrf.mxu1 }
  0xdb   : > { %568 = vst [vmem:[%s1036_s7 + $0x10] sm:$0xff] %v448_v22  ;;  %v440_v24 = vadd.f32 %v1031_v20, %v439_v23  ;;  %584 = vst [vmem:[%s1036_s7 + $0x90] sm:$0xff] %v1046_v30  ;;  %v1053_v38 = vadd.f32 %v1031_v20, %v503_v32  ;;  %v637_v40 = vmul.f32 %v448_v22, %v448_v22 }
  0xdc   : > { %v870_v25 = vpop.f32.mrf.mxu0  ;;  %v886_v39 = vpop.f32.mrf.mxu1 }
  0xdd   : > { %566 = vst [vmem:[%s1036_s7] sm:$0xff] %v440_v24  ;;  %v451_v26 = vadd.f32 %v870_v25, %v1031_v20  ;;  %v635_v33 = vmul.f32 %v440_v24, %v440_v24  ;;  %582 = vst [vmem:[%s1036_s7 + $0x80] sm:$0xff] %v1053_v38  ;;  %v1060_v45 = vadd.f32 %v886_v39, %v1031_v20 }
  0xde   : > { %v442_v27 = vpop.f32.mrf.mxu0  ;;  %v506_v46 = vpop.f32.mrf.mxu1 }
  0xdf   : > { %569 = vst [vmem:[%s1036_s7 + $0x18] sm:$0xff] %v451_v26  ;;  %v443_v29 = vadd.f32 %v1031_v20, %v442_v27  ;;  %v638_v47 = vmul.f32 %v451_v26, %v451_v26  ;;  %585 = vst [vmem:[%s1036_s7 + $0x98] sm:$0xff] %v1060_v45  ;;  %v1067_v52 = vadd.f32 %v1031_v20, %v506_v46 }
  0xe0   : > { %v873_v31 = vpop.f32.mrf.mxu0  ;;  %v889_v53 = vpop.f32.mrf.mxu1 }
  0xe1   : > { %567 = vst [vmem:[%s1036_s7 + $0x8] sm:$0xff] %v443_v29  ;;  %v598_v34 = vadd.f32 %v443_v29, %v440_v24  ;;  %v636_v35 = vmul.f32 %v443_v29, %v443_v29  ;;  %v464_v36 = vadd.f32 %v873_v31, %v1031_v20  ;;  %583 = vst [vmem:[%s1036_s7 + $0x88] sm:$0xff] %v1067_v52 }
  0xe2   : > { %v455_v37 = vpop.f32.mrf.mxu0  ;;  %v1074_v59 = vadd.f32 %v889_v53, %v1031_v20  ;;  %v519_v60 = vpop.f32.mrf.mxu1 }
  0xe3   : > { %v599_v41 = vadd.f32 %v598_v34, %v448_v22  ;;  %v667_v42 = vadd.f32 %v636_v35, %v635_v33  ;;  %572 = vst [vmem:[%s1036_s7 + $0x30] sm:$0xff] %v464_v36  ;;  %v456_v43 = vadd.f32 %v1031_v20, %v455_v37  ;;  %v1081_v2 = vadd.f32 %v1031_v20, %v519_v60 }
  0xe4   : > { %v874_v44 = vpop.f32.mrf.mxu0  ;;  %588 = vst [vmem:[%s1036_s7 + $0xb0] sm:$0xff] %v1074_v59  ;;  %v890_v3 = vpop.f32.mrf.mxu1  ;;  %v641_v4 = vmul.f32 %v464_v36, %v464_v36 }
  0xe5   : > { %v668_v48 = vadd.f32 %v667_v42, %v637_v40  ;;  %570 = vst [vmem:[%s1036_s7 + $0x20] sm:$0xff] %v456_v43  ;;  %v600_v49 = vadd.f32 %v599_v41, %v451_v26  ;;  %v467_v50 = vadd.f32 %v874_v44, %v1031_v20  ;;  %v639_v55 = vmul.f32 %v456_v43, %v456_v43 }
  0xe6   : > { %v458_v51 = vpop.f32.mrf.mxu0  ;;  %586 = vst [vmem:[%s1036_s7 + $0xa0] sm:$0xff] %v1081_v2  ;;  %v1088_v9 = vadd.f32 %v890_v3, %v1031_v20  ;;  %v522_v10 = vpop.f32.mrf.mxu1 }
  0xe7   : > { %v601_v54 = vadd.f32 %v600_v49, %v456_v43  ;;  %v669_v56 = vadd.f32 %v668_v48, %v638_v47  ;;  %573 = vst [vmem:[%s1036_s7 + $0x38] sm:$0xff] %v467_v50  ;;  %v459_v57 = vadd.f32 %v1031_v20, %v458_v51  ;;  %v642_v11 = vmul.f32 %v467_v50, %v467_v50 }
  0xe8   : > { %v877_v58 = vpop.f32.mrf.mxu0  ;;  %589 = vst [vmem:[%s1036_s7 + $0xb8] sm:$0xff] %v1088_v9  ;;  %v1095_v16 = vadd.f32 %v1031_v20, %v522_v10  ;;  %v893_v17 = vpop.f32.mrf.mxu1  ;;  %v651_v10 = vmul.f32 %v1053_v38, %v1053_v38 }
  0xe9   : > { %v670_v61 = vadd.f32 %v669_v56, %v639_v55  ;;  %571 = vst [vmem:[%s1036_s7 + $0x28] sm:$0xff] %v459_v57  ;;  %v602_v62 = vadd.f32 %v601_v54, %v459_v57  ;;  %v640_v63 = vmul.f32 %v459_v57, %v459_v57  ;;  %v480_v0 = vadd.f32 %v877_v58, %v1031_v20 }
  0xea   : > { %v471_v1 = vpop.f32.mrf.mxu0  ;;  %587 = vst [vmem:[%s1036_s7 + $0xa8] sm:$0xff] %v1095_v16  ;;  %v1102_v24 = vadd.f32 %v893_v17, %v1031_v20  ;;  %v535_v25 = vpop.f32.mrf.mxu1  ;;  %v653_v17 = vmul.f32 %v1046_v30, %v1046_v30 }
  0xeb   : > { %v603_v5 = vadd.f32 %v602_v62, %v464_v36  ;;  %v671_v6 = vadd.f32 %v670_v61, %v640_v63  ;;  %576 = vst [vmem:[%s1036_s7 + $0x50] sm:$0xff] %v480_v0  ;;  %v472_v7 = vadd.f32 %v1031_v20, %v471_v1  ;;  %v1109_v32 = vadd.f32 %v1031_v20, %v535_v25 }
  0xec   : > { %v878_v8 = vpop.f32.mrf.mxu0  ;;  %592 = vst [vmem:[%s1036_s7 + $0xd0] sm:$0xff] %v1102_v24  ;;  %v894_v33 = vpop.f32.mrf.mxu1  ;;  %v645_v34 = vmul.f32 %v480_v0, %v480_v0 }
  0xed   : > { %v672_v12 = vadd.f32 %v671_v6, %v641_v4  ;;  %574 = vst [vmem:[%s1036_s7 + $0x40] sm:$0xff] %v472_v7  ;;  %v604_v13 = vadd.f32 %v603_v5, %v467_v50  ;;  %v483_v14 = vadd.f32 %v878_v8, %v1031_v20  ;;  %v643_v19 = vmul.f32 %v472_v7, %v472_v7 }
  0xee   : > { %v474_v15 = vpop.f32.mrf.mxu0  ;;  %590 = vst [vmem:[%s1036_s7 + $0xc0] sm:$0xff] %v1109_v32  ;;  %v1116_v40 = vadd.f32 %v894_v33, %v1031_v20  ;;  %v538_v41 = vpop.f32.mrf.mxu1 }
  0xef   : > { %v605_v18 = vadd.f32 %v604_v13, %v472_v7  ;;  %v673_v21 = vadd.f32 %v672_v12, %v642_v11  ;;  %577 = vst [vmem:[%s1036_s7 + $0x58] sm:$0xff] %v483_v14  ;;  %v475_v22 = vadd.f32 %v1031_v20, %v474_v15  ;;  %v646_v42 = vmul.f32 %v483_v14, %v483_v14 }
  0xf0   : > { %v881_v23 = vpop.f32.mrf.mxu0  ;;  %593 = vst [vmem:[%s1036_s7 + $0xd8] sm:$0xff] %v1116_v40  ;;  %v539_v48 = vadd.f32 %v1031_v20, %v538_v41  ;;  %v897_v49 = vpop.f32.mrf.mxu1 }
  0xf1   : > { %v674_v26 = vadd.f32 %v673_v21, %v643_v19  ;;  %575 = vst [vmem:[%s1036_s7 + $0x48] sm:$0xff] %v475_v22  ;;  %v606_v27 = vadd.f32 %v605_v18, %v475_v22  ;;  %v644_v28 = vmul.f32 %v475_v22, %v475_v22  ;;  %v496_v29 = vadd.f32 %v881_v23, %v1031_v20 }
  0xf2   : > { %v487_v31 = vpop.f32.mrf.mxu0  ;;  %591 = vst [vmem:[%s1036_s7 + $0xc8] sm:$0xff] %v539_v48  ;;  %v1127_v55 = vadd.f32 %v897_v49, %v1031_v20  ;;  %v551_v56 = vpop.f32.mrf.mxu1  ;;  %v655_v23 = vmul.f32 %v1081_v2, %v1081_v2 }
  0xf3   : > { %v607_v35 = vadd.f32 %v606_v27, %v480_v0  ;;  %v675_v36 = vadd.f32 %v674_v26, %v644_v28  ;;  %580 = vst [vmem:[%s1036_s7 + $0x70] sm:$0xff] %v496_v29  ;;  %v488_v37 = vadd.f32 %v1031_v20, %v487_v31  ;;  %v552_v61 = vadd.f32 %v1031_v20, %v551_v56 }
  0xf4   : > { %v882_v39 = vpop.f32.mrf.mxu0  ;;  %596 = vst [vmem:[%s1036_s7 + $0xf0] sm:$0xff] %v1127_v55  ;;  %v898_v62 = vpop.f32.mrf.mxu1  ;;  %v649_v63 = vmul.f32 %v496_v29, %v496_v29  ;;  %v656_v27 = vmul.f32 %v1095_v16, %v1095_v16 }
  0xf5   : > { %v676_v43 = vadd.f32 %v675_v36, %v645_v34  ;;  %578 = vst [vmem:[%s1036_s7 + $0x60] sm:$0xff] %v488_v37  ;;  %v608_v44 = vadd.f32 %v607_v35, %v483_v14  ;;  %v499_v46 = vadd.f32 %v882_v39, %v1031_v20  ;;  %v647_v51 = vmul.f32 %v488_v37, %v488_v37 }
  0xf6   : > { %v490_v47 = vpop.f32.mrf.mxu0  ;;  %594 = vst [vmem:[%s1036_s7 + $0xe0] sm:$0xff] %v552_v61  ;;  %v563_v3 = vadd.f32 %v898_v62, %v1031_v20  ;;  %v554_v4 = vpop.f32.mrf.mxu1  ;;  %v652_v14 = vmul.f32 %v1067_v52, %v1067_v52  ;;  %v659_v34 = vmul.f32 %v1109_v32, %v1109_v32  ;;  %v661_v39 = vmul.f32 %v1102_v24, %v1102_v24 }
  0xf7   : > { %v609_v50 = vadd.f32 %v608_v44, %v488_v37  ;;  %v677_v53 = vadd.f32 %v676_v43, %v646_v42  ;;  %581 = vst [vmem:[%s1036_s7 + $0x78] sm:$0xff] %v499_v46  ;;  %v491_v54 = vadd.f32 %v1031_v20, %v490_v47  ;;  %v650_v5 = vmul.f32 %v499_v46, %v499_v46 }
  0xf8   : > { %597 = vst [vmem:[%s1036_s7 + $0xf8] sm:$0xff] %v563_v3  ;;  %v555_v8 = vadd.f32 %v1031_v20, %v554_v4  ;;  %v654_v20 = vmul.f32 %v1060_v45, %v1060_v45  ;;  %v660_v37 = vmul.f32 %v539_v48, %v539_v48  ;;  %v662_v42 = vmul.f32 %v1116_v40, %v1116_v40 }
  0xf9   : > { %v678_v57 = vadd.f32 %v677_v53, %v647_v51  ;;  %579 = vst [vmem:[%s1036_s7 + $0x68] sm:$0xff] %v491_v54  ;;  %v610_v58 = vadd.f32 %v609_v50, %v491_v54  ;;  %v648_v60 = vmul.f32 %v491_v54, %v491_v54  ;;  %v665_v50 = vmul.f32 %v1127_v55, %v1127_v55 }
  0xfa   : > { %595 = vst [vmem:[%s1036_s7 + $0xe8] sm:$0xff] %v555_v8  ;;  %v666_v53 = vmul.f32 %v563_v3, %v563_v3 }
  0xfb   : > { %v611_v0 = vadd.f32 %v610_v58, %v496_v29  ;;  %v679_v1 = vadd.f32 %v678_v57, %v648_v60 }
  0xfd   : > { %v680_v6 = vadd.f32 %v679_v1, %v649_v63  ;;  %v612_v7 = vadd.f32 %v611_v0, %v499_v46  ;;  %v663_v46 = vmul.f32 %v552_v61, %v552_v61 }
  0xff   : > { %v613_v11 = vadd.f32 %v612_v7, %v1053_v38  ;;  %v681_v12 = vadd.f32 %v680_v6, %v650_v5 }
 0x101   : > { %v614_v13 = vadd.f32 %v613_v11, %v1067_v52  ;;  %v682_v15 = vadd.f32 %v681_v12, %v651_v10 }
 0x103   : > { %v615_v18 = vadd.f32 %v614_v13, %v1046_v30  ;;  %v683_v19 = vadd.f32 %v682_v15, %v652_v14  ;;  %v657_v30 = vmul.f32 %v1074_v59, %v1074_v59 }
 0x105   : > { %v684_v21 = vadd.f32 %v683_v19, %v653_v17  ;;  %v616_v38 = vadd.f32 %v615_v18, %v1060_v45  ;;  %v658_v45 = vmul.f32 %v1088_v9, %v1088_v9 }
 0x107   : > { %v617_v22 = vadd.f32 %v616_v38, %v1081_v2  ;;  %v685_v25 = vadd.f32 %v684_v21, %v654_v20 }
 0x109   : > { %v686_v52 = vadd.f32 %v685_v25, %v655_v23  ;;  %v618_v26 = vadd.f32 %v617_v22, %v1095_v16 }
 0x10b   : > { %v619_v28 = vadd.f32 %v618_v26, %v1074_v59  ;;  %v687_v29 = vadd.f32 %v686_v52, %v656_v27 }
 0x10d   : > { %v688_v31 = vadd.f32 %v687_v29, %v657_v30  ;;  %v620_v33 = vadd.f32 %v619_v28, %v1088_v9 }
 0x10f   : > { %v621_v2 = vadd.f32 %v620_v33, %v1109_v32  ;;  %v689_v35 = vadd.f32 %v688_v31, %v658_v45 }
 0x111   : > { %v690_v36 = vadd.f32 %v689_v35, %v659_v34  ;;  %v622_v16 = vadd.f32 %v621_v2, %v539_v48  ;;  %v664_v48 = vmul.f32 %v555_v8, %v555_v8 }
 0x113   : > { %v623_v59 = vadd.f32 %v622_v16, %v1102_v24  ;;  %v691_v41 = vadd.f32 %v690_v36, %v660_v37 }
 0x115   : > { %v692_v43 = vadd.f32 %v691_v41, %v661_v39  ;;  %v624_v9 = vadd.f32 %v623_v59, %v1116_v40 }
 0x117   : > { %v625_v44 = vadd.f32 %v624_v9, %v552_v61  ;;  %v693_v32 = vadd.f32 %v692_v43, %v662_v42 }
 0x119   : > { %v694_v47 = vadd.f32 %v693_v32, %v663_v46  ;;  %v626_v49 = vadd.f32 %v625_v44, %v555_v8 }
 0x11b   : > { %v627_v24 = vadd.f32 %v626_v49, %v1127_v55  ;;  %v695_v51 = vadd.f32 %v694_v47, %v664_v48 }
 0x11d   : > { %v628_v54 = vadd.f32 %v627_v24, %v563_v3  ;;  %v696_v56 = vadd.f32 %v695_v51, %v665_v50 }
 0x11f   : > { %v629_v57 = vrot.slane %v628_v54, 4  ;;  %v697_v58 = vadd.f32 %v696_v56, %v666_v53 }
 0x121   : > { %v630_v40 = vadd.f32 %v629_v57, %v628_v54  ;;  %v698_v60 = vrot.slane %v697_v58, 4 }
 0x123   : > { %v631_v61 = vrot.slane %v630_v40, 2  ;;  %v699_v62 = vadd.f32 %v698_v60, %v697_v58 }
 0x125   : > { %v632_v63 = vadd.f32 %v631_v61, %v630_v40  ;;  %v700_v0 = vrot.slane %v699_v62, 2 }
 0x127   : > { %v633_v1 = vrot.slane %v632_v63, 1  ;;  %v701_v4 = vadd.f32 %v700_v0, %v699_v62 }
 0x129   : > { %v702_v5 = vrot.slane %v701_v4, 1  ;;  %v634_v55 = vadd.f32 %v633_v1, %v632_v63 }
 0x12b   : > { %v703_v3 = vadd.f32 %v702_v5, %v701_v4 }
 0x12d   : > { %v705_v6 = vsel %vm704_vm2, %v634_v55, %v703_v3 }
 0x12e   : > { %706 = vst [vmem:[%s211_s11] sm:$0x3] %v705_v6 }
 0x12f PF: > { %s15_s15 = sadd.s32 1, %s940_s15  }
 0x130   : > { %p12_p5 = scmp.ge.s32.totalorder %s15_s15, 4  }
 0x132   :  { %14 = sbr.rel (!%p12_p5) target bundleno = 1 (0x1), region = 74 }

</bundles_post_ra>
